<compile_context>
chip_gen: v6e
topology: v6e:2x2x1
jax: 0.10.0
libtpu: 0.0.40
codegen_flags: <defaults>
</compile_context>

<pallas_src>
import functools

import jax
import jax.numpy as jnp
from jax.experimental import pallas as pl
from jax.experimental.pallas import tpu as pltpu

_HIDDEN = 200          # PyTorch hidden_layer_1 output dim
_HIDDEN_PAD = 256      # lane-aligned padding (zero-padded, numerically exact)


# ------------------------------------------------------------------ kernel ---

def _gtnn_fused_kernel(set_idx_ref,                     # SMEM scalar prefetch [B, 2] int32
                       adj_ref, x_ref, w_gin_ref, b_gin_ref,
                       ir_ref, wa_ref, ba_ref, w1a_ref, w1b_ref, b1_ref,
                       w2_ref, b2_ref,
                       o_ref,
                       h_scratch):
    i = pl.program_id(0)
    tm = adj_ref.shape[0]                               # adjacency row tile

    # ---- GIN layer, eps=0:  h = ReLU( (A @ x + x) @ W_gin + b_gin ), rows [i*tm, (i+1)*tm)
    row0 = pl.multiple_of(i * tm, tm)
    agg = jnp.dot(adj_ref[...], x_ref[...],             # bf16 x bf16 -> f32 acc (MXU-native)
                  preferred_element_type=jnp.float32)
    agg = agg + x_ref[pl.ds(row0, tm), :].astype(jnp.float32)   # + (1+eps)*x, eps = 0
    h = jnp.dot(agg, w_gin_ref[...], preferred_element_type=jnp.float32) + b_gin_ref[...]
    h_scratch[pl.ds(row0, tm), :] = jnp.maximum(h, 0.0)         # ReLU after the conv layer

    # ---- last grid step: gather pair embeddings, fuse ('concat') and decode
    @pl.when(i == pl.num_programs(0) - 1)
    def _():
        bsz = o_ref.shape[0]
        rows = []
        for b in range(bsz):                            # bsz is static and small
            i0 = set_idx_ref[b, 0]
            i1 = set_idx_ref[b, 1]
            rows.append(jnp.concatenate(
                [h_scratch[pl.ds(i0, 1), :], h_scratch[pl.ds(i1, 1), :]], axis=1))
        z = jnp.concatenate(rows, axis=0)               # [B, 2G] pair embeddings

        # S = ReLU(ir @ W_add + b_add)
        S = jnp.dot(ir_ref[...], wa_ref[...], preferred_element_type=jnp.float32) + ba_ref[...]
        S = jnp.maximum(S, 0.0)

        # concat([z, S]) @ W1 == z @ W1[:2G] + S @ W1[2G:]   (algebraically exact)
        h1 = (jnp.dot(z, w1a_ref[...], preferred_element_type=jnp.float32)
              + jnp.dot(S, w1b_ref[...], preferred_element_type=jnp.float32)
              + b1_ref[...])
        h1 = jnp.maximum(h1, 0.0)                       # [B, 256]; lanes 200..255 are exactly 0

        # final Linear(200 -> 1) as VPU multiply + lane reduce (no 1-lane MXU pass)
        logits = jnp.sum(h1 * w2_ref[...], axis=-1, keepdims=True) + b2_ref[0, 0]
        o_ref[...] = jax.nn.sigmoid(logits)


# ----------------------------------------------------------------- wrapper ---

def _row_tile(n):
    """Adjacency row tile: whole array for small N, lane/sublane-aligned tile otherwise."""
    if n <= 1024:
        return n
    for t in (1024, 512, 256, 128, 8):
        if n % t == 0:
            return t
    return n


def _fused_forward(set_idx, adj, x, ir,
                   w_gin, b_gin, wa, ba, w1a, w1b, b1, w2_row, b2):
    n, _ = x.shape
    g = w_gin.shape[1]
    bsz = ir.shape[0]
    tm = _row_tile(n)
    grid = (n // tm,)

    def _full(arr):
        nd = arr.ndim
        return pl.BlockSpec(arr.shape, lambda *_a, _nd=nd: (0,) * _nd)

    grid_spec = pltpu.PrefetchScalarGridSpec(
        num_scalar_prefetch=1,
        grid=grid,
        in_specs=[
            pl.BlockSpec((tm, n), lambda i, si: (i, 0)),        # adjacency row tile (bf16)
            _full(x),                                           # node features (bf16)
            _full(w_gin), _full(b_gin),
            _full(ir),
            _full(wa), _full(ba),
            _full(w1a), _full(w1b), _full(b1),
            _full(w2_row),
            pl.BlockSpec(memory_space=pltpu.MemorySpace.SMEM),  # scalar bias b2
        ],
        out_specs=pl.BlockSpec((bsz, 1), lambda i, si: (0, 0)),
        scratch_shapes=[pltpu.VMEM((n, g), jnp.float32)],       # node embeddings h (never hits HBM)
    )

    out = pl.pallas_call(
        _gtnn_fused_kernel,
        out_shape=jax.ShapeDtypeStruct((bsz, 1), jnp.float32),
        grid_spec=grid_spec,
        compiler_params=pltpu.CompilerParams(
            dimension_semantics=("arbitrary",),                 # h_scratch carried across steps
            vmem_limit_bytes=64 * 1024 * 1024,                  # safe cap on v5e/v6e/v7x
        ),
    )(set_idx, adj, x, w_gin, b_gin, ir, wa, ba, w1a, w1b, b1, w2_row, b2)
    return out[:, 0]                                            # squeeze(dim=1)


# ------------------------------------------------------------------- model ---

class GTNNPallas:
    """GTNN with fusion_type='concat', model_type='gin', add_additional_feature=True."""

    def __init__(self, node_feat_dim, gs_dim, additional_feature_dim, key):
        self.gs_dim = gs_dim
        two_g = 2 * gs_dim
        decoder_dim = two_g + two_g        # 2*gs_dim + ir_dim(=2*gs_dim), fusion 'concat'

        ks = jax.random.split(key, 8)

        def u(k, shape, fan_in):
            s = 1.0 / (fan_in ** 0.5)
            return jax.random.uniform(k, shape, jnp.float32, -s, s)

        # GINConv inner Linear(node_feat_dim, gs_dim)
        self.w_gin = u(ks[0], (node_feat_dim, gs_dim), node_feat_dim)
        self.b_gin = u(ks[1], (1, gs_dim), node_feat_dim)
        # hidden_layer_add_feat: Linear(additional_feature_dim, 2*gs_dim)
        self.w_add = u(ks[2], (additional_feature_dim, two_g), additional_feature_dim)
        self.b_add = u(ks[3], (1, two_g), additional_feature_dim)
        # hidden_layer_1: Linear(decoder_dim, 200); zero-pad to 256 lanes, split for fused concat
        w1 = u(ks[4], (decoder_dim, _HIDDEN), decoder_dim)
        w1 = jnp.pad(w1, ((0, 0), (0, _HIDDEN_PAD - _HIDDEN)))
        self.w1a, self.w1b = w1[:two_g], w1[two_g:]
        self.b1 = jnp.pad(u(ks[5], (1, _HIDDEN), decoder_dim),
                          ((0, 0), (0, _HIDDEN_PAD - _HIDDEN)))
        # hidden_layer_2: Linear(200, 1), stored as a zero-padded row for VPU mul + lane reduce
        w2 = u(ks[6], (_HIDDEN, 1), _HIDDEN)
        self.w2_row = jnp.pad(w2.T, ((0, 0), (0, _HIDDEN_PAD - _HIDDEN)))   # (1, 256)
        self.b2 = u(ks[7], (1, 1), _HIDDEN)

    @functools.partial(jax.jit, static_argnums=(0, 6))
    def __call__(self, x, edge_index, batch_vec, set_indices, ir_score, num_graphs):
        n = x.shape[0]
        # dense adjacency, messages src -> dst (PyG direction); built in f32 (exact integer
        # counts), cast to bf16 for the MXU. A + I is NOT materialized (handled in-kernel).
        src, dst = edge_index[0], edge_index[1]
        adj = jnp.zeros((n, n), jnp.float32).at[dst, src].add(1.0).astype(jnp.bfloat16)

        # get_minibatch_embeddings index bases (assumes batch_vec sorted by graph, as in PyG)
        num_nodes = jnp.bincount(batch_vec, length=num_graphs)
        index_bases = jnp.concatenate(
            [jnp.zeros((1,), jnp.int32), jnp.cumsum(num_nodes)[:-1].astype(jnp.int32)])
        set_indices_batch = (index_bases[:, None] + set_indices).astype(jnp.int32)   # [B, 2]

        return _fused_forward(
            set_indices_batch, adj, x.astype(jnp.bfloat16), ir_score,
            self.w_gin, self.b_gin, self.w_add, self.b_add,
            self.w1a, self.w1b, self.b1, self.w2_row, self.b2)


# --------------------------------------------------------------------- main --

if __name__ == "__main__":
    key = jax.random.PRNGKey(0)
    k_x, k_e, k_ir, k_p = jax.random.split(key, 4)

    # small, consistent shapes
    node_feat_dim = 16
    gs_dim = 32
    additional_feature_dim = 8
    num_graphs = 2
    nodes_per_graph = 8
    n_nodes = num_graphs * nodes_per_graph
    n_edges = 32

    x = jax.random.normal(k_x, (n_nodes, node_feat_dim), jnp.float32)
    edge_index = jax.random.randint(k_e, (2, n_edges), 0, n_nodes, jnp.int32)
    batch_vec = jnp.repeat(jnp.arange(num_graphs, dtype=jnp.int32), nodes_per_graph)
    set_indices = jnp.array([[0, 3], [1, 5]], jnp.int32)          # local per-graph node pairs
    ir_score = jax.random.normal(k_ir, (num_graphs, additional_feature_dim), jnp.float32)

    model = GTNNPallas(node_feat_dim, gs_dim, additional_feature_dim, k_p)
    out = model(x, edge_index, batch_vec, set_indices, ir_score, num_graphs)
    jax.block_until_ready(out)

    assert out.shape == (num_graphs,)
    assert bool(jnp.all((out >= 0.0) & (out <= 1.0)))
    print("KERNEL_OK")
</pallas_src>

<mosaic_0001>
module attributes {stable_mosaic.version = 11 : i64} {
  func.func private @main(%arg0: i32) attributes {dimension_semantics = [#tpu.dimension_semantics<core_parallel>], iteration_bounds = array<i64: 2>, tpu.core_type = #tpu.core_type<sc_scalar_subcore>, window_params = []} {
    return
  }
}

module attributes {stable_mosaic.version = 11 : i64} {
  func.func private @main(%arg0: i32) attributes {dimension_semantics = [#tpu.dimension_semantics<core_parallel>], iteration_bounds = array<i64: 2>, tpu.core_type = #tpu.core_type<sc_scalar_subcore>, window_params = []} {
    return
  }
}

module attributes {stable_mosaic.version = 11 : i64} {
  func.func @_gtnn_fused_kernel(%arg0: i32, %arg1: memref<2x2xi32, #tpu.memory_space<smem>>, %arg2: memref<16x16xbf16, #tpu.memory_space<vmem>>, %arg3: memref<16x16xbf16, #tpu.memory_space<vmem>>, %arg4: memref<16x32xf32, #tpu.memory_space<vmem>>, %arg5: memref<1x32xf32, #tpu.memory_space<vmem>>, %arg6: memref<2x8xf32, #tpu.memory_space<vmem>>, %arg7: memref<8x64xf32, #tpu.memory_space<vmem>>, %arg8: memref<1x64xf32, #tpu.memory_space<vmem>>, %arg9: memref<64x256xf32, #tpu.memory_space<vmem>>, %arg10: memref<64x256xf32, #tpu.memory_space<vmem>>, %arg11: memref<1x256xf32, #tpu.memory_space<vmem>>, %arg12: memref<1x256xf32, #tpu.memory_space<vmem>>, %arg13: memref<1x1xf32, #tpu.memory_space<smem>>, %arg14: memref<2x1xf32, #tpu.memory_space<vmem>>, %arg15: memref<16x32xf32, #tpu.memory_space<vmem>>) attributes {dimension_semantics = [#tpu.dimension_semantics<arbitrary>], iteration_bounds = array<i64: 1>, scalar_prefetch = 1 : i64, scratch_operands = 1 : i64, tpu.core_type = #tpu.core_type<tc>, window_params = [{transform_indices = @transform_0, window_bounds = array<i64: 16, 16>}, {pipeline_mode = #tpu.pipeline_mode<synchronous>, transform_indices = @transform_1, window_bounds = array<i64: 16, 16>}, {pipeline_mode = #tpu.pipeline_mode<synchronous>, transform_indices = @transform_2, window_bounds = array<i64: 16, 32>}, {pipeline_mode = #tpu.pipeline_mode<synchronous>, transform_indices = @transform_3, window_bounds = array<i64: 1, 32>}, {pipeline_mode = #tpu.pipeline_mode<synchronous>, transform_indices = @transform_4, window_bounds = array<i64: 2, 8>}, {pipeline_mode = #tpu.pipeline_mode<synchronous>, transform_indices = @transform_5, window_bounds = array<i64: 8, 64>}, {pipeline_mode = #tpu.pipeline_mode<synchronous>, transform_indices = @transform_6, window_bounds = array<i64: 1, 64>}, {pipeline_mode = #tpu.pipeline_mode<synchronous>, transform_indices = @transform_7, window_bounds = array<i64: 64, 256>}, {pipeline_mode = #tpu.pipeline_mode<synchronous>, transform_indices = @transform_8, window_bounds = array<i64: 64, 256>}, {pipeline_mode = #tpu.pipeline_mode<synchronous>, transform_indices = @transform_9, window_bounds = array<i64: 1, 256>}, {pipeline_mode = #tpu.pipeline_mode<synchronous>, transform_indices = @transform_10, window_bounds = array<i64: 1, 256>}, {transform_indices = @transform_11, window_bounds = array<i64: 1, 1>}, {pipeline_mode = #tpu.pipeline_mode<synchronous>, transform_indices = @transform_12, window_bounds = array<i64: 2, 1>}]} {
    %c16_i32 = arith.constant 16 : i32
    %0 = arith.muli %arg0, %c16_i32 : i32
    %1 = tpu.assume_multiple %0, 16 : i32
    %c0 = arith.constant 0 : index
    %c0_0 = arith.constant 0 : index
    %2 = vector.load %arg2[%c0, %c0_0] : memref<16x16xbf16, #tpu.memory_space<vmem>>, vector<16x16xbf16>
    %c0_1 = arith.constant 0 : index
    %c0_2 = arith.constant 0 : index
    %3 = vector.load %arg3[%c0_1, %c0_2] : memref<16x16xbf16, #tpu.memory_space<vmem>>, vector<16x16xbf16>
    %cst = arith.constant dense<0.000000e+00> : vector<16x16xf32>
    %4 = tpu.matmul %2, %3, %cst {dimension_numbers = #tpu.dot_dimension_numbers<[1], [0], [0], [1], [0, 0, 1, 1], [], []>} : vector<16x16xbf16>, vector<16x16xbf16>, vector<16x16xf32> -> vector<16x16xf32>
    %5 = arith.index_cast %1 : i32 to index
    %c0_3 = arith.constant 0 : index
    %6 = vector.load %arg3[%5, %c0_3] : memref<16x16xbf16, #tpu.memory_space<vmem>>, vector<16x16xbf16>
    %7 = arith.extf %6 : vector<16x16xbf16> to vector<16x16xf32>
    %8 = arith.addf %4, %7 : vector<16x16xf32>
    %c0_4 = arith.constant 0 : index
    %c0_5 = arith.constant 0 : index
    %9 = vector.load %arg4[%c0_4, %c0_5] : memref<16x32xf32, #tpu.memory_space<vmem>>, vector<16x32xf32>
    %cst_6 = arith.constant dense<0.000000e+00> : vector<16x32xf32>
    %10 = tpu.matmul %8, %9, %cst_6 {dimension_numbers = #tpu.dot_dimension_numbers<[1], [0], [0], [1], [0, 0, 1, 1], [], []>} : vector<16x16xf32>, vector<16x32xf32>, vector<16x32xf32> -> vector<16x32xf32>
    %c0_7 = arith.constant 0 : index
    %c0_8 = arith.constant 0 : index
    %11 = vector.load %arg5[%c0_7, %c0_8] : memref<1x32xf32, #tpu.memory_space<vmem>>, vector<1x32xf32>
    %12 = vector.broadcast %11 : vector<1x32xf32> to vector<16x32xf32>
    %13 = arith.addf %10, %12 : vector<16x32xf32>
    %cst_9 = arith.constant 0.000000e+00 : f32
    %14 = vector.broadcast %cst_9 : f32 to vector<16x32xf32>
    %15 = arith.maximumf %13, %14 : vector<16x32xf32>
    %16 = arith.index_cast %1 : i32 to index
    %c0_10 = arith.constant 0 : index
    %17 = vector.load %arg15[%16, %c0_10] : memref<16x32xf32, #tpu.memory_space<vmem>>, vector<16x32xf32>
    tpu.vector_store %arg15[%16, %c0_10], %15 {strides = array<i32>} : memref<16x32xf32, #tpu.memory_space<vmem>>, vector<16x32xf32>,
    %c0_i32 = arith.constant 0 : i32
    %18 = arith.cmpi eq, %arg0, %c0_i32 : i32
    %19 = arith.extui %18 : i1 to i32
    %c0_i32_11 = arith.constant 0 : i32
    %20 = arith.cmpi ne, %19, %c0_i32_11 : i32
    scf.if %20 {
      %c0_12 = arith.constant 0 : index
      %c0_13 = arith.constant 0 : index
      %21 = memref.load %arg1[%c0_12, %c0_13] : memref<2x2xi32, #tpu.memory_space<smem>>
      %c0_14 = arith.constant 0 : index
      %c1 = arith.constant 1 : index
      %22 = memref.load %arg1[%c0_14, %c1] : memref<2x2xi32, #tpu.memory_space<smem>>
      %23 = arith.index_cast %21 : i32 to index
      %c0_15 = arith.constant 0 : index
      %24 = vector.load %arg15[%23, %c0_15] : memref<16x32xf32, #tpu.memory_space<vmem>>, vector<1x32xf32>
      %25 = arith.index_cast %22 : i32 to index
      %c0_16 = arith.constant 0 : index
      %26 = vector.load %arg15[%25, %c0_16] : memref<16x32xf32, #tpu.memory_space<vmem>>, vector<1x32xf32>
      %27 = tpu.concatenate %24, %26 in 1 : vector<1x32xf32>, vector<1x32xf32> -> vector<1x64xf32>
      %c1_17 = arith.constant 1 : index
      %c0_18 = arith.constant 0 : index
      %28 = memref.load %arg1[%c1_17, %c0_18] : memref<2x2xi32, #tpu.memory_space<smem>>
      %c1_19 = arith.constant 1 : index
      %c1_20 = arith.constant 1 : index
      %29 = memref.load %arg1[%c1_19, %c1_20] : memref<2x2xi32, #tpu.memory_space<smem>>
      %30 = arith.index_cast %28 : i32 to index
      %c0_21 = arith.constant 0 : index
      %31 = vector.load %arg15[%30, %c0_21] : memref<16x32xf32, #tpu.memory_space<vmem>>, vector<1x32xf32>
      %32 = arith.index_cast %29 : i32 to index
      %c0_22 = arith.constant 0 : index
      %33 = vector.load %arg15[%32, %c0_22] : memref<16x32xf32, #tpu.memory_space<vmem>>, vector<1x32xf32>
      %34 = tpu.concatenate %31, %33 in 1 : vector<1x32xf32>, vector<1x32xf32> -> vector<1x64xf32>
      %35 = tpu.concatenate %27, %34 in 0 : vector<1x64xf32>, vector<1x64xf32> -> vector<2x64xf32>
      %c0_23 = arith.constant 0 : index
      %c0_24 = arith.constant 0 : index
      %36 = vector.load %arg6[%c0_23, %c0_24] : memref<2x8xf32, #tpu.memory_space<vmem>>, vector<2x8xf32>
      %c0_25 = arith.constant 0 : index
      %c0_26 = arith.constant 0 : index
      %37 = vector.load %arg7[%c0_25, %c0_26] : memref<8x64xf32, #tpu.memory_space<vmem>>, vector<8x64xf32>
      %cst_27 = arith.constant dense<0.000000e+00> : vector<2x64xf32>
      %38 = tpu.matmul %36, %37, %cst_27 {dimension_numbers = #tpu.dot_dimension_numbers<[1], [0], [0], [1], [0, 0, 1, 1], [], []>} : vector<2x8xf32>, vector<8x64xf32>, vector<2x64xf32> -> vector<2x64xf32>
      %c0_28 = arith.constant 0 : index
      %c0_29 = arith.constant 0 : index
      %39 = vector.load %arg8[%c0_28, %c0_29] : memref<1x64xf32, #tpu.memory_space<vmem>>, vector<1x64xf32>
      %40 = vector.broadcast %39 : vector<1x64xf32> to vector<2x64xf32>
      %41 = arith.addf %38, %40 : vector<2x64xf32>
      %cst_30 = arith.constant 0.000000e+00 : f32
      %42 = vector.broadcast %cst_30 : f32 to vector<2x64xf32>
      %43 = arith.maximumf %41, %42 : vector<2x64xf32>
      %c0_31 = arith.constant 0 : index
      %c0_32 = arith.constant 0 : index
      %44 = vector.load %arg9[%c0_31, %c0_32] : memref<64x256xf32, #tpu.memory_space<vmem>>, vector<64x256xf32>
      %cst_33 = arith.constant dense<0.000000e+00> : vector<2x256xf32>
      %45 = tpu.matmul %35, %44, %cst_33 {dimension_numbers = #tpu.dot_dimension_numbers<[1], [0], [0], [1], [0, 0, 1, 1], [], []>} : vector<2x64xf32>, vector<64x256xf32>, vector<2x256xf32> -> vector<2x256xf32>
      %c0_34 = arith.constant 0 : index
      %c0_35 = arith.constant 0 : index
      %46 = vector.load %arg10[%c0_34, %c0_35] : memref<64x256xf32, #tpu.memory_space<vmem>>, vector<64x256xf32>
      %cst_36 = arith.constant dense<0.000000e+00> : vector<2x256xf32>
      %47 = tpu.matmul %43, %46, %cst_36 {dimension_numbers = #tpu.dot_dimension_numbers<[1], [0], [0], [1], [0, 0, 1, 1], [], []>} : vector<2x64xf32>, vector<64x256xf32>, vector<2x256xf32> -> vector<2x256xf32>
      %48 = arith.addf %45, %47 : vector<2x256xf32>
      %c0_37 = arith.constant 0 : index
      %c0_38 = arith.constant 0 : index
      %49 = vector.load %arg11[%c0_37, %c0_38] : memref<1x256xf32, #tpu.memory_space<vmem>>, vector<1x256xf32>
      %50 = vector.broadcast %49 : vector<1x256xf32> to vector<2x256xf32>
      %51 = arith.addf %48, %50 : vector<2x256xf32>
      %cst_39 = arith.constant 0.000000e+00 : f32
      %52 = vector.broadcast %cst_39 : f32 to vector<2x256xf32>
      %53 = arith.maximumf %51, %52 : vector<2x256xf32>
      %c0_40 = arith.constant 0 : index
      %c0_41 = arith.constant 0 : index
      %54 = vector.load %arg12[%c0_40, %c0_41] : memref<1x256xf32, #tpu.memory_space<vmem>>, vector<1x256xf32>
      %55 = vector.broadcast %54 : vector<1x256xf32> to vector<2x256xf32>
      %56 = arith.mulf %53, %55 : vector<2x256xf32>
      %cst_42 = arith.constant dense<0.000000e+00> : vector<2xf32>
      %57 = vector.multi_reduction <add>, %56, %cst_42 [1] : vector<2x256xf32> to vector<2xf32>
      %58 = vector.shape_cast %57 : vector<2xf32> to vector<2x1xf32>
      %c0_43 = arith.constant 0 : index
      %c0_44 = arith.constant 0 : index
      %59 = memref.load %arg13[%c0_43, %c0_44] : memref<1x1xf32, #tpu.memory_space<smem>>
      %60 = vector.broadcast %59 : f32 to vector<2x1xf32>
      %61 = arith.addf %58, %60 : vector<2x1xf32>
      %62 = arith.negf %61 : vector<2x1xf32>
      %63 = math.exp %62 : vector<2x1xf32>
      %cst_45 = arith.constant 1.000000e+00 : f32
      %64 = vector.broadcast %cst_45 : f32 to vector<2x1xf32>
      %65 = arith.addf %64, %63 : vector<2x1xf32>
      %66 = arith.divf %64, %65 : vector<2x1xf32>
      %c0_46 = arith.constant 0 : index
      %c0_47 = arith.constant 0 : index
      %67 = vector.load %arg14[%c0_46, %c0_47] : memref<2x1xf32, #tpu.memory_space<vmem>>, vector<2x1xf32>
      tpu.vector_store %arg14[%c0_46, %c0_47], %66 {strides = array<i32>} : memref<2x1xf32, #tpu.memory_space<vmem>>, vector<2x1xf32>,
    } else {
    }
    return
  }
  func.func @transform_0(%arg0: i32, %arg1: memref<2x2xi32, #tpu.memory_space<smem>>) -> (i32, i32) {
    %c0_i32 = arith.constant 0 : i32
    %c0_i32_0 = arith.constant 0 : i32
    return %arg0, %c0_i32 : i32, i32
  }
  func.func @transform_1(%arg0: i32, %arg1: memref<2x2xi32, #tpu.memory_space<smem>>) -> (i32, i32) {
    %c0_i32 = arith.constant 0 : i32
    %c0_i32_0 = arith.constant 0 : i32
    %c0_i32_1 = arith.constant 0 : i32
    return %c0_i32, %c0_i32_0 : i32, i32
  }
  func.func @transform_2(%arg0: i32, %arg1: memref<2x2xi32, #tpu.memory_space<smem>>) -> (i32, i32) {
    %c0_i32 = arith.constant 0 : i32
    %c0_i32_0 = arith.constant 0 : i32
    %c0_i32_1 = arith.constant 0 : i32
    return %c0_i32, %c0_i32_0 : i32, i32
  }
  func.func @transform_3(%arg0: i32, %arg1: memref<2x2xi32, #tpu.memory_space<smem>>) -> (i32, i32) {
    %c0_i32 = arith.constant 0 : i32
    %c0_i32_0 = arith.constant 0 : i32
    %c0_i32_1 = arith.constant 0 : i32
    return %c0_i32, %c0_i32_0 : i32, i32
  }
  func.func @transform_4(%arg0: i32, %arg1: memref<2x2xi32, #tpu.memory_space<smem>>) -> (i32, i32) {
    %c0_i32 = arith.constant 0 : i32
    %c0_i32_0 = arith.constant 0 : i32
    %c0_i32_1 = arith.constant 0 : i32
    return %c0_i32, %c0_i32_0 : i32, i32
  }
  func.func @transform_5(%arg0: i32, %arg1: memref<2x2xi32, #tpu.memory_space<smem>>) -> (i32, i32) {
    %c0_i32 = arith.constant 0 : i32
    %c0_i32_0 = arith.constant 0 : i32
    %c0_i32_1 = arith.constant 0 : i32
    return %c0_i32, %c0_i32_0 : i32, i32
  }
  func.func @transform_6(%arg0: i32, %arg1: memref<2x2xi32, #tpu.memory_space<smem>>) -> (i32, i32) {
    %c0_i32 = arith.constant 0 : i32
    %c0_i32_0 = arith.constant 0 : i32
    %c0_i32_1 = arith.constant 0 : i32
    return %c0_i32, %c0_i32_0 : i32, i32
  }
  func.func @transform_7(%arg0: i32, %arg1: memref<2x2xi32, #tpu.memory_space<smem>>) -> (i32, i32) {
    %c0_i32 = arith.constant 0 : i32
    %c0_i32_0 = arith.constant 0 : i32
    %c0_i32_1 = arith.constant 0 : i32
    return %c0_i32, %c0_i32_0 : i32, i32
  }
  func.func @transform_8(%arg0: i32, %arg1: memref<2x2xi32, #tpu.memory_space<smem>>) -> (i32, i32) {
    %c0_i32 = arith.constant 0 : i32
    %c0_i32_0 = arith.constant 0 : i32
    %c0_i32_1 = arith.constant 0 : i32
    return %c0_i32, %c0_i32_0 : i32, i32
  }
  func.func @transform_9(%arg0: i32, %arg1: memref<2x2xi32, #tpu.memory_space<smem>>) -> (i32, i32) {
    %c0_i32 = arith.constant 0 : i32
    %c0_i32_0 = arith.constant 0 : i32
    %c0_i32_1 = arith.constant 0 : i32
    return %c0_i32, %c0_i32_0 : i32, i32
  }
  func.func @transform_10(%arg0: i32, %arg1: memref<2x2xi32, #tpu.memory_space<smem>>) -> (i32, i32) {
    %c0_i32 = arith.constant 0 : i32
    %c0_i32_0 = arith.constant 0 : i32
    %c0_i32_1 = arith.constant 0 : i32
    return %c0_i32, %c0_i32_0 : i32, i32
  }
  func.func @transform_11(%arg0: i32, %arg1: memref<2x2xi32, #tpu.memory_space<smem>>) -> (i32, i32) {
    %c0_i32 = arith.constant 0 : i32
    %c0_i32_0 = arith.constant 0 : i32
    %c0_i32_1 = arith.constant 0 : i32
    return %c0_i32, %c0_i32_0 : i32, i32
  }
  func.func @transform_12(%arg0: i32, %arg1: memref<2x2xi32, #tpu.memory_space<smem>>) -> (i32, i32) {
    %c0_i32 = arith.constant 0 : i32
    %c0_i32_0 = arith.constant 0 : i32
    %c0_i32_1 = arith.constant 0 : i32
    return %c0_i32, %c0_i32_0 : i32, i32
  }
}

</mosaic_0001>

<bundles_post_ra>
// kernel: a_call__.1
= control target key start
LH: loop header
LB: loop body
LE: loop exit
PB: predicated region body
PF: predicated region fallthrough
CT: control target
= control target key end

     0   :  { %s859_s0 = inlined_call_operand.vmem [shape: s32[2,2], index: 0, kind: input, shape index: {}]   ;;  %s860_s1 = inlined_call_operand.vmem [shape: bf16[16,16], index: 1, kind: input, shape index: {}]   ;;  %s861_s2 = inlined_call_operand.vmem [shape: bf16[16,16], index: 2, kind: input, shape index: {}]   ;;  %s862_s3 = inlined_call_operand.vmem [shape: f32[16,32], index: 3, kind: input, shape index: {}]   ;;  %s863_s4 = inlined_call_operand.vmem [shape: f32[1,32], index: 4, kind: input, shape index: {}]   ;;  %s864_s5 = inlined_call_operand.vmem [shape: f32[2,8], index: 5, kind: input, shape index: {}]   ;;  %s865_s6 = inlined_call_operand.vmem [shape: f32[8,64], index: 6, kind: input, shape index: {}]   ;;  %s866_s7 = inlined_call_operand.vmem [shape: f32[1,64], index: 7, kind: input, shape index: {}]   ;;  %s867_s8 = inlined_call_operand.vmem [shape: f32[64,256], index: 8, kind: input, shape index: {}]   ;;  %s868_s9 = inlined_call_operand.vmem [shape: f32[64,256], index: 9, kind: input, shape index: {}]   ;;  %s869_s10 = inlined_call_operand.vmem [shape: f32[1,256], index: 10, kind: input, shape index: {}]   ;;  %s870_s11 = inlined_call_operand.vmem [shape: f32[1,256], index: 11, kind: input, shape index: {}]   ;;  %s871_s12 = inlined_call_operand.<no memory space> [shape: f32[1,1], index: 12, kind: input, shape index: {}]   ;;  %s872_s13 = inlined_call_operand.vmem [shape: f32[2,1], index: 13, kind: output, shape index: {}]  }
   0x1   :  { %s18_s27 = sshll.u32 %s859_s0, 4  ;;  %s19_s27 = int_to_ptr.vmem [resolvable:$true] %s18_s27 }
   0x2   :  { %s622_s28 = scalar_lea.vmem %s19_s27, 32  ;;  %p627_p1 = scmp.lt.s32.totalorder %s19_s27, %s19_s27 }
   0x3   :  { %p623_p0 = scmp.ne.s32.totalorder %s19_s27, %s622_s28  ;;  %p628_p2 = scmp.lt.s32.totalorder %s622_s28, %s622_s28 }
   0x5   :  { %p629_p3 = por %p628_p2, %p627_p1 }
   0x7   :  { %p630_p4 = pnand %p629_p3, %p623_p0 }
   0x9   :  { %633 = shalt.err (!%p630_p4)  }
   0xa   :  { %s636_s29 = smov [#allocation4]  }
   0xb   :  { %21 = dma.vmem_to_smem %s19_s27, 32, %s636_s29, [#allocation3] }
   0xc   :  { %634 = dma.done.wait [#allocation3], 32 }
   0xd   :  { %635 = vsyncadd [#allocation3], 4294967264 }
   0xe   :  { %24 = sfence }
   0xf   :  { %v616_v0 = vld [vmem:[%s861_s2] sm:$0xff]   ;;  %v637_v1 = vmov 0.0   ;;  %vm638_vm0 = vmmov 0   ;;  %vm74_vm1 = vcmask 130048   ;;  %v120_v3 = vld [vmem:[%s862_s3 + $0x8] sm:$0xff]  ;;  %vm255_vm2 = vcmask 64512  }
  0x10   :  { %594 = vmatprep.subr.bf16.mxu0 %v637_v1  ;;  %v617_v2 = vld [vmem:[%s860_s1] sm:$0xff]   ;;  %596 = vmatprep.mubr.msk.bf16.mxu0 %vm638_vm0, %v637_v1  ;;  %v361_v16 = vld [vmem:[%s868_s9 + $0x78] sm:$0xff]  ;;  %v360_v17 = vld [vmem:[%s868_s9 + $0x70] sm:$0xff]  ;;  %vm212_vm3 = vcmask 261120   ;;  %s576_s30 = sld [smem:[#allocation4 + $0x81]]  ;;  %vm362_vm4 = vcmask 523264  }
  0x11   :  { %595 = vmatpush3.bf16.msra.mxu0 %v616_v0  ;;  %600 = vmatprep.subr.mxu1 %v120_v3  ;;  %v119_v4 = vld [vmem:[%s862_s3] sm:$0xff]  ;;  %v359_v18 = vld [vmem:[%s868_s9 + $0x68] sm:$0xff]  ;;  %v345_v19 = vld [vmem:[%s867_s8 + $0x78] sm:$0xff]  ;;  %s639_s3 = smov 32   ;;  %s575_s24 = sld [smem:[#allocation4 + $0x80]]  ;;  %vm244_vm5 = vcmask 1040384  }
  0x12   :  { %601 = vmatpush3.msra.mxu1 %v120_v3  ;;  %v583_v5 = vld [vmem:[%s861_s2] sm:$0xff]   ;;  %382 = vmatprep.subr.mxu0 %v361_v16  ;;  %v344_v21 = vld [vmem:[%s867_s8 + $0x70] sm:$0xff]  ;;  %v357_v22 = vld [vmem:[%s868_s9 + $0x58] sm:$0xff]  ;;  %s219_s25 = sld [smem:[#allocation4]]  ;;  %vm541_vm6 = vcmask 1041408   ;;  %vm556_vm7 = vcmask 1024  }
  0x13   :  { %602 = vmatprep.subr.mxu1 %v119_v4  ;;  %v584_v6 = vunpack.c.l.bf16 %v583_v5  ;;  %v585_v9 = vunpack.c.h.bf16 %v583_v5  ;;  %v247_v13 = vld [vmem:[%s865_s6] sm:$0xff]  ;;  %v343_v23 = vld [vmem:[%s867_s8 + $0x68] sm:$0xff]  ;;  %v356_v24 = vld [vmem:[%s868_s9 + $0x50] sm:$0xff] }
  0x14   :  { %597 = vmatmul.mubr.msk.bf16.vlgmr.msra.gmra.mxu0 %vm74_vm1, %v617_v2  ;;  %603 = vmatpush3.msra.mxu1 %v119_v4  ;;  %v246_v15 = vld [vmem:[%s864_s5] sm:$0x3]  ;;  %v341_v26 = vld [vmem:[%s867_s8 + $0x58] sm:$0xff]  ;;  %v355_v27 = vld [vmem:[%s868_s9 + $0x48] sm:$0xff] }
  0x15   :  { %430 = vmatprep.mubr.f32.mxu0 %v637_v1  ;;  %607 = vmatprep.subr.mxu1 %v637_v1  ;;  %v358_v20 = vld [vmem:[%s868_s9 + $0x60] sm:$0xff]  ;;  %v340_v28 = vld [vmem:[%s867_s8 + $0x50] sm:$0xff]  ;;  %v339_v30 = vld [vmem:[%s867_s8 + $0x48] sm:$0xff] }
  0x16   :  { %383 = vmatpush1.msra.mxu0 %v360_v17  ;;  %v342_v25 = vld [vmem:[%s867_s8 + $0x60] sm:$0xff]  ;;  %v353_v31 = vld [vmem:[%s868_s9 + $0x38] sm:$0xff]  ;;  %v352_v33 = vld [vmem:[%s868_s9 + $0x30] sm:$0xff]  ;;  %s234_s2 = scalar_lea.vmem [#allocation2], %s576_s30 }
  0x17   :  { %384 = vmatprep.subr.mxu0 %v359_v18  ;;  %v354_v29 = vld [vmem:[%s868_s9 + $0x40] sm:$0xff]  ;;  %v337_v34 = vld [vmem:[%s867_s8 + $0x38] sm:$0xff]  ;;  %v351_v35 = vld [vmem:[%s868_s9 + $0x28] sm:$0xff]  ;;  %s232_s26 = scalar_lea.vmem [#allocation2], %s575_s24 }
  0x18   :  { %385 = vmatpush1.msra.mxu0 %v358_v20  ;;  %v338_v32 = vld [vmem:[%s867_s8 + $0x40] sm:$0xff]  ;;  %v336_v36 = vld [vmem:[%s867_s8 + $0x30] sm:$0xff]  ;;  %v349_v41 = vld [vmem:[%s868_s9 + $0x18] sm:$0xff] }
  0x19   :  { %386 = vmatprep.subr.mxu0 %v357_v22  ;;  %v350_v37 = vld [vmem:[%s868_s9 + $0x20] sm:$0xff]  ;;  %v335_v42 = vld [vmem:[%s867_s8 + $0x28] sm:$0xff]  ;;  %v348_v45 = vld [vmem:[%s868_s9 + $0x10] sm:$0xff] }
  0x1a   :  { %387 = vmatpush1.msra.mxu0 %v356_v24  ;;  %v571_v38 = vld [vmem:[%s863_s4] ss:$0 sm:$0xff]  ;;  %v347_v49 = vld [vmem:[%s868_s9 + $0x8] sm:$0xff]  ;;  %v333_v50 = vld [vmem:[%s867_s8 + $0x18] sm:$0xff] }
  0x1b   :  { %388 = vmatprep.subr.mxu0 %v355_v27  ;;  %v577_v44 = vld [vmem:[%s866_s7] ss:$0 sm:$0xff]  ;;  %v332_v53 = vld [vmem:[%s867_s8 + $0x10] sm:$0xff]  ;;  %v331_v57 = vld [vmem:[%s867_s8 + $0x8] sm:$0xff] }
  0x1c   :  { %389 = vmatpush1.msra.mxu0 %v354_v29  ;;  %v334_v46 = vld [vmem:[%s867_s8 + $0x20] sm:$0xff] }
  0x1d   :  { %390 = vmatprep.subr.mxu0 %v353_v31  ;;  %v346_v51 = vld [vmem:[%s868_s9] sm:$0xff]  ;;  %s574_s9 = sld [smem:[#allocation4 + $0x1]]  ;;  %v548_v31 = vstv %s871_s12 }
  0x1e   :  { %391 = vmatpush1.msra.mxu0 %v352_v33  ;;  %v330_v59 = vld [vmem:[%s867_s8] sm:$0xff]  ;;  %s221_s8 = scalar_lea.vmem [#allocation2], %s219_s25 }
  0x1f   :  { %392 = vmatprep.subr.mxu0 %v351_v35 }
  0x20   :  { %393 = vmatpush1.msra.mxu0 %v350_v37 }
  0x21   :  { %394 = vmatprep.subr.mxu0 %v349_v41 }
  0x22   :  { %395 = vmatpush1.msra.mxu0 %v348_v45 }
  0x23   :  { %396 = vmatprep.subr.mxu0 %v347_v49  ;;  %s223_s23 = scalar_lea.vmem [#allocation2], %s574_s9 }
  0x24   :  { %397 = vmatpush1.msra.mxu0 %v346_v51 }
  0xd4   :  { %v112_v7 = vpop.f32.mrf.mxu0 }
  0xd5   :  { %v113_v8 = vadd.f32 %v584_v6, %v112_v7  ;;  %v513_v6 = vlaneseq }
  0xd6   :  { %v598_v10 = vpop.f32.mrf.mxu0 }
  0xd7   :  { %604 = vmatprep.mubr.msk.f32.mxu1 %vm74_vm1, %v113_v8  ;;  %v514_v7 = vshrl.u32 %v513_v6, 7 }
  0xd8   :  { %v115_v11 = vpop.f32.mrf.mxu0 }
  0xd9   :  { %v116_v12 = vadd.f32 %v585_v9, %v115_v11  ;;  %v515_v8 = vsub.s32 0, %v514_v7  ;;  %v511_v9 = vld [vmem:[%s869_s10] sm:$0x3]  ;;  %v519_v10 = vsub.s32 1, %v514_v7 }
  0xda   :  { %v599_v14 = vpop.f32.mrf.mxu0 }
  0xdb   :  { %605 = vmatmul.mubr.msk.f32.vlgmr.msra.gmra.mxu1 %vm74_vm1, %v116_v12  ;;  %v516_v12 = vrot.slane %v511_v9, %v515_v8  ;;  %v527_v14 = vld [vmem:[%s870_s11] sm:$0x3]  ;;  %v520_v16 = vrot.slane %v511_v9, %v519_v10 }
  0xdc   :  { %608 = vmatpush3.msra.mxu1 %v247_v13  ;;  %609 = vmatprep.mubr.msk.f32.mxu1 %vm638_vm0, %v637_v1  ;;  %v536_v24 = vrot.slane %v527_v14, %v519_v10 }
  0xdd   :  { %456 = vmatprep.subr.mxu1 %v345_v19 }
  0xdf   :  { %610 = vmatmul.mubr.msk.f32.vlgmr.msra.gmra.mxu1 %vm255_vm2, %v246_v15 }
  0xe0   :  { %504 = vmatprep.mubr.f32.mxu1 %v637_v1  ;;  %457 = vmatpush1.msra.mxu1 %v344_v21  ;;  %v532_v21 = vrot.slane %v527_v14, %v515_v8 }
  0xe1   :  { %458 = vmatprep.subr.mxu1 %v343_v23 }
  0xe2   :  { %459 = vmatpush1.msra.mxu1 %v342_v25 }
  0xe3   :  { %460 = vmatprep.subr.mxu1 %v341_v26 }
  0xe4   :  { %461 = vmatpush1.msra.mxu1 %v340_v28 }
  0xe5   :  { %462 = vmatprep.subr.mxu1 %v339_v30 }
  0xe6   :  { %463 = vmatpush1.msra.mxu1 %v338_v32 }
  0xe7   :  { %464 = vmatprep.subr.mxu1 %v337_v34 }
  0xe8   :  { %465 = vmatpush1.msra.mxu1 %v336_v36 }
  0xe9   :  { %466 = vmatprep.subr.mxu1 %v335_v42 }
  0xea   :  { %467 = vmatpush1.msra.mxu1 %v334_v46 }
  0xeb   :  { %468 = vmatprep.subr.mxu1 %v333_v50 }
  0xec   :  { %469 = vmatpush1.msra.mxu1 %v332_v53 }
  0xed   :  { %470 = vmatprep.subr.mxu1 %v331_v57 }
  0xee   :  { %471 = vmatpush1.msra.mxu1 %v330_v59 }
 0x19b   :  { %v606_v39 = vpop.f32.mrf.mxu1 }
 0x19c   :  { %v206_v40 = vadd.f32 %v606_v39, %v571_v38 }
 0x19d   :  { %v200_v43 = vpop.f32.mrf.mxu1 }
 0x19e   :  { %v210_v47 = vmax.f32 %v206_v40, 0.0  ;;  %v201_v48 = vadd.f32 %v571_v38, %v200_v43 }
 0x19f   :  { %v325_v52 = vpop.f32.mrf.mxu1 }
 0x1a0   :  { %214 = vst.msk [vmem:[#allocation2 + $0x8] sm:$0xff] %vm212_vm3, %v210_v47  ;;  %v209_v54 = vmax.f32 %v201_v48, 0.0  ;;  %v326_v55 = vadd.f32 %v577_v44, %v325_v52 }
 0x1a1   :  { %v611_v56 = vpop.f32.mrf.mxu1 }
 0x1a2   :  { %213 = vst.msk [vmem:[#allocation2] sm:$0xff] %vm212_vm3, %v209_v54  ;;  %v329_v58 = vmax.f32 %v326_v55, 0.0 }
 0x1a4   :  { %579 = vmatmul.mubr.msk.f32.vlgmr.msra.gmra.mxu0 %vm362_vm4, %v329_v58 }
 0x1a9   :  { %v235_v60 = vld [vmem:[%s234_s2] sm:$0x1] }
 0x1aa   :  { %237 = vrot.lane.b32.xlu0 %v235_v60, %s639_s3  ;;  %v224_v61 = vld [vmem:[%s223_s23] sm:$0x1] }
 0x1ab   :  { %v233_v63 = vld [vmem:[%s232_s26] sm:$0x1] }
 0x1ac   :  { %v222_v3 = vld [vmem:[%s221_s8] sm:$0x1] }
 0x1ae   :  { %226 = vrot.lane.b32.xlu0 %v224_v61, %s639_s3 }
 0x21c   :  { %v238_v62 = vpop.permute.xlu0 %237 }
 0x21d   :  { %v240_v0 = vsel %vm212_vm3, %v233_v63, %v238_v62 }
 0x21e   :  { %v242_v1 = vrot.slane %v240_v0, 7 }
 0x220   :  { %v227_v2 = vpop.permute.xlu0 %226 }
 0x221   :  { %v229_v4 = vsel %vm212_vm3, %v222_v3, %v227_v2 }
 0x222   :  { %v245_v5 = vsel %vm244_vm5, %v229_v4, %v242_v1 }
 0x223   :  { %580 = vmatmul.mubr.msk.f32.vlgmr.msra.gmra.mxu1 %vm362_vm4, %v245_v5 }
 0x264   :  { %v432_v11 = vpop.f32.mrf.mxu0 }
 0x266   :  { %v434_v17 = vpop.f32.mrf.mxu0 }
 0x2e3   :  { %v506_v13 = vpop.f32.mrf.mxu1 }
 0x2e4   :  { %v507_v15 = vadd.f32 %v506_v13, %v432_v11 }
 0x2e5   :  { %v508_v18 = vpop.f32.mrf.mxu1 }
 0x2e6   :  { %v523_v19 = vadd.f32 %v516_v12, %v507_v15  ;;  %v509_v20 = vadd.f32 %v508_v18, %v434_v17 }
 0x2e8   :  { %v525_v22 = vmax.f32 %v523_v19, 0.0  ;;  %v524_v23 = vadd.f32 %v520_v16, %v509_v20 }
 0x2ea   :  { %v526_v25 = vmax.f32 %v524_v23, 0.0  ;;  %v539_v26 = vmul.f32 %v532_v21, %v525_v22 }
 0x2ec   :  { %v540_v27 = vmul.f32 %v536_v24, %v526_v25  ;;  %v542_v28 = vsel %vm541_vm6, %v539_v26, 0.0 }
 0x2ee   :  { %v543_v29 = vsel %vm541_vm6, %v540_v27, 0.0 }
 0x2ef   :  { %v544_v30 = vadd.f32 %v543_v29, %v542_v28 }
 0x2f1   :  { %545 = vadd.xlane.f32.xlu1 %v544_v30 }
 0x37a   :  { %v546_v32 = vpop.xlane.xlu1 %545 }
 0x37b   :  { %v549_v33 = vadd.f32 %v548_v31, %v546_v32 }
 0x37d   :  { %v581_v34 = vmul.f32 -1.442695, %v549_v33 }
 0x37f   :  { %618 = vpow2.f32 %v581_v34 }
 0x38c   :  { %v619_v35 = vpop.eup %618 }
 0x38d   :  { %v553_v36 = vadd.f32 1.0, %v619_v35 }
 0x38f   :  { %620 = vrcp.f32 %v553_v36 }
 0x39c   :  { %v621_v37 = vpop.eup %620 }
 0x39d   :  { %557 = vst.msk [vmem:[%s872_s13] sm:$0x3] %vm556_vm7, %v621_v37 }

</bundles_post_ra>
